<compile_context>
chip_gen: v6e
topology: v6e:2x2x1
jax: 0.10.0
libtpu: 0.0.40
codegen_flags: <defaults>
</compile_context>

<pallas_src>
import functools

import jax
import jax.numpy as jnp
from jax.experimental import pallas as pl


# ----------------------------------------------------------------------------
# Single fused kernel:
#   conv (K tap matmuls) -> +bias -> ReLU -> strided avg-pool (selection
#   matmul) -> |z1-z2|, |z2-z3| -> Linear(2F, 1)
# ----------------------------------------------------------------------------
def fused_ts_kernel(x_ref, w_ref, b_ref, wh1_ref, wh2_ref, bh_ref, o_ref, *,
                    batch, seq_len, t_out, stride):
    n_rows = x_ref.shape[0]            # 3*B*T (stream-major, then batch, then time)
    n_groups = n_rows // seq_len       # 3*B
    k_taps = w_ref.shape[0]            # K
    n_pos = n_rows - (k_taps - 1)      # all stride-1 positions; invalid/cross-batch
                                       # positions are zeroed by the pooling matrix.

    # Conv1d as K shifted 2-D matmuls on the MXU:
    #   acc[p, f] = sum_k x_flat[p + k, :] @ w_taps[k]
    acc = jnp.dot(x_ref[0:n_pos, :], w_ref[0],
                  preferred_element_type=jnp.float32)
    for k in range(1, k_taps):
        acc = acc + jnp.dot(x_ref[k:k + n_pos, :], w_ref[k],
                            preferred_element_type=jnp.float32)
    y = jnp.maximum(acc + b_ref[...], 0.0)                      # (n_pos, F)

    # Per-(stream,batch) mean over the T_out stride-`stride` positions as a
    # single (3B, n_pos) @ (n_pos, F) MXU matmul with a 0 / (1/T_out)
    # selection matrix built from iota (tail / cross-batch positions -> 0).
    g = jax.lax.broadcasted_iota(jnp.int32, (n_groups, n_pos), 0)
    p = jax.lax.broadcasted_iota(jnp.int32, (n_groups, n_pos), 1)
    off = p - g * seq_len
    sel = (off >= 0) & (off <= (t_out - 1) * stride) & (off % stride == 0)
    pool = jnp.where(sel, jnp.float32(1.0 / t_out), jnp.float32(0.0))
    z = jnp.dot(pool, y, preferred_element_type=jnp.float32)    # (3B, F)

    # Head: |z1-z2|, |z2-z3| -> concat -> Linear(2F, 1); the concat + single
    # matmul is expressed as two half-matmuls (numerically identical).
    z1 = z[0:batch, :]
    z2 = z[batch:2 * batch, :]
    z3 = z[2 * batch:3 * batch, :]
    d1 = jnp.abs(z1 - z2)
    d2 = jnp.abs(z2 - z3)
    out = jnp.dot(d1, wh1_ref[...], preferred_element_type=jnp.float32)
    out = out + jnp.dot(d2, wh2_ref[...], preferred_element_type=jnp.float32)
    o_ref[...] = out + bh_ref[...]                              # (B, 1)


def run_fused(x_flat, w_taps, b_conv, wh1, wh2, bh, *,
              batch, seq_len, t_out, stride):
    kern = functools.partial(fused_ts_kernel, batch=batch, seq_len=seq_len,
                             t_out=t_out, stride=stride)
    # Single grid step, full arrays resident in VMEM (shapes are tiny).
    return pl.pallas_call(
        kern,
        out_shape=jax.ShapeDtypeStruct((batch, 1), jnp.float32),
    )(x_flat, w_taps, b_conv, wh1, wh2, bh)


# ----------------------------------------------------------------------------
# Wrapper: pure layout plumbing (no im2col, no data duplication).
# ----------------------------------------------------------------------------
@functools.partial(jax.jit, static_argnames=("k", "stride"))
def temporal_shuffling_forward(x1, x2, x3, params, k=4, stride=2):
    w_conv, b_conv, w_head, b_head = params
    feat, c_in, k_taps = w_conv.shape
    assert k_taps == k
    batch, _, seq_len = x1.shape
    t_out = (seq_len - k) // stride + 1

    # Stack the three streams and flatten to (3*B*T, C), channels on lanes.
    xs = jnp.stack([x1, x2, x3], axis=0)                        # (3, B, C, T)
    x_flat = jnp.transpose(xs, (0, 1, 3, 2)).reshape(3 * batch * seq_len, c_in)

    # Conv weight (F, C, K) -> (K, C, F): w_taps[k] is the (C, F) matrix for tap k.
    w_taps = jnp.transpose(w_conv, (2, 1, 0))
    wh1 = w_head[:feat, :]
    wh2 = w_head[feat:, :]

    return run_fused(x_flat, w_taps, b_conv.reshape(1, feat), wh1, wh2,
                     b_head.reshape(1, 1), batch=batch, seq_len=seq_len,
                     t_out=t_out, stride=stride)


# ----------------------------------------------------------------------------
# Reference (pure JAX) for sanity checking
# ----------------------------------------------------------------------------
def reference_forward(x1, x2, x3, params, k=4, stride=2):
    w_conv, b_conv, w_head, b_head = params

    def encode(x):
        y = jax.lax.conv_general_dilated(
            x, w_conv, window_strides=(stride,), padding="VALID",
            dimension_numbers=("NCH", "OIH", "NCH"))
        y = y + b_conv[None, :, None]
        y = jnp.maximum(y, 0.0)
        return jnp.mean(y, axis=-1)                              # (B, F)

    z1, z2, z3 = encode(x1), encode(x2), encode(x3)
    out = jnp.concatenate([jnp.abs(z1 - z2), jnp.abs(z2 - z3)], axis=-1)
    return out @ w_head + b_head[None, :]


if __name__ == "__main__":
    # Module config: input_size=16, input_channels=4, feature_dim=32
    B, C_in, T = 2, 4, 16
    F = 32
    K, STRIDE = 4, 2

    key = jax.random.PRNGKey(0)
    k1, k2, k3, k4, k5, k6, k7 = jax.random.split(key, 7)

    x1 = jax.random.normal(k1, (B, C_in, T), dtype=jnp.float32)
    x2 = jax.random.normal(k2, (B, C_in, T), dtype=jnp.float32)
    x3 = jax.random.normal(k3, (B, C_in, T), dtype=jnp.float32)

    # Deterministic parameter init (synthetic; shapes follow the module).
    w_conv = 0.1 * jax.random.normal(k4, (F, C_in, K), dtype=jnp.float32)   # Conv1d weight
    b_conv = 0.1 * jax.random.normal(k5, (F,), dtype=jnp.float32)           # Conv1d bias
    w_head = 0.1 * jax.random.normal(k6, (2 * F, 1), dtype=jnp.float32)     # Linear(2F, 1)
    b_head = 0.1 * jax.random.normal(k7, (1,), dtype=jnp.float32)

    params = (w_conv, b_conv, w_head, b_head)

    out = temporal_shuffling_forward(x1, x2, x3, params, k=K, stride=STRIDE)
    out = jax.block_until_ready(out)

    ref = reference_forward(x1, x2, x3, params, k=K, stride=STRIDE)
    assert out.shape == (B, 1), out.shape
    assert jnp.allclose(out, ref, atol=1e-4, rtol=1e-4), (out, ref)

    print("KERNEL_OK")
</pallas_src>

<mosaic_0001>
module attributes {stable_mosaic.version = 11 : i64} {
  func.func @fused_ts_kernel(%arg0: memref<96x4xf32, #tpu.memory_space<vmem>>, %arg1: memref<4x4x32xf32, #tpu.memory_space<vmem>>, %arg2: memref<1x32xf32, #tpu.memory_space<vmem>>, %arg3: memref<32x1xf32, #tpu.memory_space<vmem>>, %arg4: memref<32x1xf32, #tpu.memory_space<vmem>>, %arg5: memref<1x1xf32, #tpu.memory_space<vmem>>, %arg6: memref<2x1xf32, #tpu.memory_space<vmem>>) attributes {dimension_semantics = [], scalar_prefetch = 0 : i64, scratch_operands = 0 : i64, tpu.core_type = #tpu.core_type<tc>} {
    %c0 = arith.constant 0 : index
    %c0_0 = arith.constant 0 : index
    %0 = vector.load %arg0[%c0, %c0_0] : memref<96x4xf32, #tpu.memory_space<vmem>>, vector<93x4xf32>
    %c0_1 = arith.constant 0 : index
    %c0_2 = arith.constant 0 : index
    %c0_3 = arith.constant 0 : index
    %1 = vector.load %arg1[%c0_1, %c0_2, %c0_3] : memref<4x4x32xf32, #tpu.memory_space<vmem>>, vector<1x4x32xf32>
    %2 = vector.shape_cast %1 : vector<1x4x32xf32> to vector<4x32xf32>
    %cst = arith.constant dense<0.000000e+00> : vector<93x32xf32>
    %3 = tpu.matmul %0, %2, %cst {dimension_numbers = #tpu.dot_dimension_numbers<[1], [0], [0], [1], [0, 0, 1, 1], [], []>} : vector<93x4xf32>, vector<4x32xf32>, vector<93x32xf32> -> vector<93x32xf32>
    %c1 = arith.constant 1 : index
    %c0_4 = arith.constant 0 : index
    %4 = vector.load %arg0[%c1, %c0_4] : memref<96x4xf32, #tpu.memory_space<vmem>>, vector<93x4xf32>
    %c1_5 = arith.constant 1 : index
    %c0_6 = arith.constant 0 : index
    %c0_7 = arith.constant 0 : index
    %5 = vector.load %arg1[%c1_5, %c0_6, %c0_7] : memref<4x4x32xf32, #tpu.memory_space<vmem>>, vector<1x4x32xf32>
    %6 = vector.shape_cast %5 : vector<1x4x32xf32> to vector<4x32xf32>
    %cst_8 = arith.constant dense<0.000000e+00> : vector<93x32xf32>
    %7 = tpu.matmul %4, %6, %cst_8 {dimension_numbers = #tpu.dot_dimension_numbers<[1], [0], [0], [1], [0, 0, 1, 1], [], []>} : vector<93x4xf32>, vector<4x32xf32>, vector<93x32xf32> -> vector<93x32xf32>
    %8 = arith.addf %3, %7 : vector<93x32xf32>
    %c2 = arith.constant 2 : index
    %c0_9 = arith.constant 0 : index
    %9 = vector.load %arg0[%c2, %c0_9] : memref<96x4xf32, #tpu.memory_space<vmem>>, vector<93x4xf32>
    %c2_10 = arith.constant 2 : index
    %c0_11 = arith.constant 0 : index
    %c0_12 = arith.constant 0 : index
    %10 = vector.load %arg1[%c2_10, %c0_11, %c0_12] : memref<4x4x32xf32, #tpu.memory_space<vmem>>, vector<1x4x32xf32>
    %11 = vector.shape_cast %10 : vector<1x4x32xf32> to vector<4x32xf32>
    %cst_13 = arith.constant dense<0.000000e+00> : vector<93x32xf32>
    %12 = tpu.matmul %9, %11, %cst_13 {dimension_numbers = #tpu.dot_dimension_numbers<[1], [0], [0], [1], [0, 0, 1, 1], [], []>} : vector<93x4xf32>, vector<4x32xf32>, vector<93x32xf32> -> vector<93x32xf32>
    %13 = arith.addf %8, %12 : vector<93x32xf32>
    %c3 = arith.constant 3 : index
    %c0_14 = arith.constant 0 : index
    %14 = vector.load %arg0[%c3, %c0_14] : memref<96x4xf32, #tpu.memory_space<vmem>>, vector<93x4xf32>
    %c3_15 = arith.constant 3 : index
    %c0_16 = arith.constant 0 : index
    %c0_17 = arith.constant 0 : index
    %15 = vector.load %arg1[%c3_15, %c0_16, %c0_17] : memref<4x4x32xf32, #tpu.memory_space<vmem>>, vector<1x4x32xf32>
    %16 = vector.shape_cast %15 : vector<1x4x32xf32> to vector<4x32xf32>
    %cst_18 = arith.constant dense<0.000000e+00> : vector<93x32xf32>
    %17 = tpu.matmul %14, %16, %cst_18 {dimension_numbers = #tpu.dot_dimension_numbers<[1], [0], [0], [1], [0, 0, 1, 1], [], []>} : vector<93x4xf32>, vector<4x32xf32>, vector<93x32xf32> -> vector<93x32xf32>
    %18 = arith.addf %13, %17 : vector<93x32xf32>
    %c0_19 = arith.constant 0 : index
    %c0_20 = arith.constant 0 : index
    %19 = vector.load %arg2[%c0_19, %c0_20] : memref<1x32xf32, #tpu.memory_space<vmem>>, vector<1x32xf32>
    %20 = vector.broadcast %19 : vector<1x32xf32> to vector<93x32xf32>
    %21 = arith.addf %18, %20 : vector<93x32xf32>
    %cst_21 = arith.constant 0.000000e+00 : f32
    %22 = vector.broadcast %cst_21 : f32 to vector<93x32xf32>
    %23 = arith.maximumf %21, %22 : vector<93x32xf32>
    %24 = tpu.iota {dimensions = array<i32: 0>} : vector<6x93xi32>
    %25 = tpu.iota {dimensions = array<i32: 1>} : vector<6x93xi32>
    %c16_i32 = arith.constant 16 : i32
    %26 = vector.broadcast %c16_i32 : i32 to vector<6x93xi32>
    %27 = arith.muli %24, %26 : vector<6x93xi32>
    %28 = arith.subi %25, %27 : vector<6x93xi32>
    %c0_i32 = arith.constant 0 : i32
    %29 = vector.broadcast %c0_i32 : i32 to vector<6x93xi32>
    %30 = arith.cmpi sge, %28, %29 : vector<6x93xi32>
    %c12_i32 = arith.constant 12 : i32
    %31 = vector.broadcast %c12_i32 : i32 to vector<6x93xi32>
    %32 = arith.cmpi sle, %28, %31 : vector<6x93xi32>
    %33 = arith.andi %30, %32 : vector<6x93xi1>
    %c2_i32 = arith.constant 2 : i32
    %c0_i32_22 = arith.constant 0 : i32
    %34 = arith.cmpi eq, %c2_i32, %c0_i32_22 : i32
    %c1_i32 = arith.constant 1 : i32
    %35 = arith.select %34, %c1_i32, %c2_i32 : i32
    %36 = vector.broadcast %35 : i32 to vector<6x93xi32>
    %37 = arith.remsi %28, %36 : vector<6x93xi32>
    %c0_i32_23 = arith.constant 0 : i32
    %38 = vector.broadcast %c0_i32_23 : i32 to vector<6x93xi32>
    %39 = arith.cmpi ne, %37, %38 : vector<6x93xi32>
    %c0_i32_24 = arith.constant 0 : i32
    %40 = vector.broadcast %c0_i32_24 : i32 to vector<6x93xi32>
    %41 = arith.cmpi slt, %37, %40 : vector<6x93xi32>
    %c0_i32_25 = arith.constant 0 : i32
    %42 = arith.cmpi slt, %35, %c0_i32_25 : i32
    %43 = vector.broadcast %42 : i1 to vector<6x93xi1>
    %44 = vector.broadcast %43 : vector<6x93xi1> to vector<6x93xi1>
    %45 = arith.xori %41, %44 : vector<6x93xi1>
    %46 = arith.andi %45, %39 : vector<6x93xi1>
    %47 = vector.broadcast %35 : i32 to vector<6x93xi32>
    %48 = arith.addi %37, %47 : vector<6x93xi32>
    %49 = arith.select %46, %48, %37 : vector<6x93xi1>, vector<6x93xi32>
    %c0_i32_26 = arith.constant 0 : i32
    %50 = vector.broadcast %c0_i32_26 : i32 to vector<6x93xi32>
    %51 = arith.cmpi eq, %49, %50 : vector<6x93xi32>
    %52 = arith.andi %33, %51 : vector<6x93xi1>
    %cst_27 = arith.constant 0.142857149 : f32
    %cst_28 = arith.constant 0.000000e+00 : f32
    %53 = vector.broadcast %cst_27 : f32 to vector<6x93xf32>
    %54 = vector.broadcast %cst_28 : f32 to vector<6x93xf32>
    %55 = arith.select %52, %53, %54 : vector<6x93xi1>, vector<6x93xf32>
    %cst_29 = arith.constant dense<0.000000e+00> : vector<6x32xf32>
    %56 = tpu.matmul %55, %23, %cst_29 {dimension_numbers = #tpu.dot_dimension_numbers<[1], [0], [0], [1], [0, 0, 1, 1], [], []>} : vector<6x93xf32>, vector<93x32xf32>, vector<6x32xf32> -> vector<6x32xf32>
    %57 = vector.extract_strided_slice %56 {offsets = [0, 0], sizes = [2, 32], strides = [1, 1]} : vector<6x32xf32> to vector<2x32xf32>
    %58 = vector.extract_strided_slice %56 {offsets = [2, 0], sizes = [2, 32], strides = [1, 1]} : vector<6x32xf32> to vector<2x32xf32>
    %59 = vector.extract_strided_slice %56 {offsets = [4, 0], sizes = [2, 32], strides = [1, 1]} : vector<6x32xf32> to vector<2x32xf32>
    %60 = arith.subf %57, %58 : vector<2x32xf32>
    %61 = math.absf %60 : vector<2x32xf32>
    %62 = arith.subf %58, %59 : vector<2x32xf32>
    %63 = math.absf %62 : vector<2x32xf32>
    %c0_30 = arith.constant 0 : index
    %c0_31 = arith.constant 0 : index
    %64 = vector.load %arg3[%c0_30, %c0_31] : memref<32x1xf32, #tpu.memory_space<vmem>>, vector<32x1xf32>
    %cst_32 = arith.constant dense<0.000000e+00> : vector<2x1xf32>
    %65 = tpu.matmul %61, %64, %cst_32 {dimension_numbers = #tpu.dot_dimension_numbers<[1], [0], [0], [1], [0, 0, 1, 1], [], []>} : vector<2x32xf32>, vector<32x1xf32>, vector<2x1xf32> -> vector<2x1xf32>
    %c0_33 = arith.constant 0 : index
    %c0_34 = arith.constant 0 : index
    %66 = vector.load %arg4[%c0_33, %c0_34] : memref<32x1xf32, #tpu.memory_space<vmem>>, vector<32x1xf32>
    %cst_35 = arith.constant dense<0.000000e+00> : vector<2x1xf32>
    %67 = tpu.matmul %63, %66, %cst_35 {dimension_numbers = #tpu.dot_dimension_numbers<[1], [0], [0], [1], [0, 0, 1, 1], [], []>} : vector<2x32xf32>, vector<32x1xf32>, vector<2x1xf32> -> vector<2x1xf32>
    %68 = arith.addf %65, %67 : vector<2x1xf32>
    %c0_36 = arith.constant 0 : index
    %c0_37 = arith.constant 0 : index
    %69 = vector.load %arg5[%c0_36, %c0_37] : memref<1x1xf32, #tpu.memory_space<vmem>>, vector<1x1xf32>
    %70 = vector.broadcast %69 : vector<1x1xf32> to vector<2x1xf32>
    %71 = arith.addf %68, %70 : vector<2x1xf32>
    %c0_38 = arith.constant 0 : index
    %c0_39 = arith.constant 0 : index
    %72 = vector.load %arg6[%c0_38, %c0_39] : memref<2x1xf32, #tpu.memory_space<vmem>>, vector<2x1xf32>
    tpu.vector_store %arg6[%c0_38, %c0_39], %71 {strides = array<i32>} : memref<2x1xf32, #tpu.memory_space<vmem>>, vector<2x1xf32>,
    return
  }
}

</mosaic_0001>

<bundles_post_ra>
// kernel: temporal_shuffling_forward.1
= control target key start
LH: loop header
LB: loop body
LE: loop exit
PB: predicated region body
PF: predicated region fallthrough
CT: control target
= control target key end

     0   :  { %vm89_vm0 = vcmask 1043456   ;;  %vm52_vm1 = vcmask 31744   ;;  %v1339_v52 = vmov 0.0   ;;  %vm1340_vm2 = vmmov 0   ;;  %s1736_s1 = inlined_call_operand.vmem [shape: f32[4,4,32], index: 1, kind: input, shape index: {}]   ;;  %s1737_s0 = inlined_call_operand.vmem [shape: f32[96,4], index: 0, kind: input, shape index: {}]   ;;  %s1738_s4 = inlined_call_operand.vmem [shape: f32[32,1], index: 4, kind: input, shape index: {}]   ;;  %s1739_s2 = inlined_call_operand.vmem [shape: f32[1,32], index: 2, kind: input, shape index: {}]   ;;  %s1740_s3 = inlined_call_operand.vmem [shape: f32[32,1], index: 3, kind: input, shape index: {}]   ;;  %s1741_s5 = inlined_call_operand.<no memory space> [shape: f32[1,1], index: 5, kind: input, shape index: {}]   ;;  %s1742_s6 = inlined_call_operand.vmem [shape: f32[2,1], index: 6, kind: output, shape index: {}]  }
   0x1   :  { %v1069_v0 = vld [vmem:[%s1736_s1 + $0x4] sm:$0xf]  ;;  %v48_v2 = vld [vmem:[%s1737_s0 + $0x51] sm:$0xff]  ;;  %v39_v3 = vld [vmem:[%s1737_s0 + $0x9] sm:$0xff]  ;;  %vm821_vm3 = vcmask 1044480   ;;  %vm817_vm13 = vcmask 760832  }
   0x2   :  { %v38_v1 = vld [vmem:[%s1737_s0 + $0x1] sm:$0xff]  ;;  %1206 = vmatprep.subr.msk.mxu0 %vm89_vm0, %v1069_v0  ;;  %1335 = vmatprep.subr.msk.mxu1 %vm89_vm0, %v1069_v0  ;;  %v49_v4 = vld [vmem:[%s1737_s0 + $0x59] sm:$0x1f]  ;;  %v40_v6 = vld [vmem:[%s1737_s0 + $0x11] sm:$0xff]  ;;  %vm910_vm14 = vcmask 261120   ;;  %vm1063_vm15 = vcmask 1024  }
   0x3   :  { %1207 = vmatpush3.msk.msra.mxu0 %vm89_vm0, %v1069_v0  ;;  %1336 = vmatpush3.msk.msra.mxu1 %vm89_vm0, %v1069_v0  ;;  %v37_v5 = vld [vmem:[%s1736_s1] sm:$0xf]  ;;  %v1110_v8 = vld [vmem:[%s1736_s1 + $0xc] sm:$0xf]  ;;  %v1096_v9 = vld [vmem:[%s1736_s1 + $0x8] sm:$0xf] }
   0x4   :  { %1208 = vmatprep.mubr.msk.f32.mxu0 %vm52_vm1, %v38_v1  ;;  %1223 = vmatprep.mubr.msk.f32.mxu1 %vm52_vm1, %v48_v2  ;;  %v25_v7 = vld [vmem:[%s1737_s0] sm:$0xff]  ;;  %v26_v11 = vld [vmem:[%s1737_s0 + $0x8] sm:$0xff]  ;;  %v27_v13 = vld [vmem:[%s1737_s0 + $0x10] sm:$0xff] }
   0x5   :  { %1209 = vmatmul.mubr.msk.f32.vlgmr.msra.gmra.mxu0 %vm52_vm1, %v39_v3  ;;  %1224 = vmatmul.mubr.msk.f32.vlgmr.msra.gmra.mxu1 %vm52_vm1, %v49_v4  ;;  %v41_v10 = vld [vmem:[%s1737_s0 + $0x19] sm:$0xff]  ;;  %v42_v12 = vld [vmem:[%s1737_s0 + $0x21] sm:$0xff]  ;;  %v43_v14 = vld [vmem:[%s1737_s0 + $0x29] sm:$0xff] }
   0x6   :  { %1226 = vmatprep.subr.msk.mxu1 %vm89_vm0, %v37_v5  ;;  %1211 = vmatprep.mubr.msk.f32.mxu0 %vm52_vm1, %v40_v6  ;;  %v28_v15 = vld [vmem:[%s1737_s0 + $0x18] sm:$0xff]  ;;  %v29_v17 = vld [vmem:[%s1737_s0 + $0x20] sm:$0xff]  ;;  %v30_v19 = vld [vmem:[%s1737_s0 + $0x28] sm:$0xff] }
   0x7   :  { %1227 = vmatpush3.msk.msra.mxu1 %vm89_vm0, %v37_v5  ;;  %1228 = vmatprep.mubr.msk.f32.mxu1 %vm52_vm1, %v25_v7  ;;  %v44_v16 = vld [vmem:[%s1737_s0 + $0x31] sm:$0xff]  ;;  %v45_v18 = vld [vmem:[%s1737_s0 + $0x39] sm:$0xff]  ;;  %v46_v20 = vld [vmem:[%s1737_s0 + $0x41] sm:$0xff] }
   0x8   :  { %1266 = vmatprep.subr.msk.mxu1 %vm89_vm0, %v1110_v8  ;;  %1246 = vmatprep.subr.msk.mxu0 %vm89_vm0, %v1096_v9  ;;  %v31_v21 = vld [vmem:[%s1737_s0 + $0x30] sm:$0xff]  ;;  %v32_v23 = vld [vmem:[%s1737_s0 + $0x38] sm:$0xff]  ;;  %v33_v24 = vld [vmem:[%s1737_s0 + $0x40] sm:$0xff] }
   0x9   :  { %1212 = vmatmul.mubr.msk.f32.gmra.mxu0 %vm52_vm1, %v41_v10  ;;  %1229 = vmatmul.mubr.msk.f32.vlgmr.msra.gmra.mxu1 %vm52_vm1, %v26_v11  ;;  %v47_v22 = vld [vmem:[%s1737_s0 + $0x49] sm:$0xff]  ;;  %v384_v29 = vld [vmem:[%s1737_s0 + $0x12] sm:$0xff]  ;;  %v385_v31 = vld [vmem:[%s1737_s0 + $0x1a] sm:$0xff] }
   0xa   :  { %1267 = vmatpush3.msk.msra.mxu1 %vm89_vm0, %v1110_v8  ;;  %1214 = vmatprep.mubr.msk.f32.mxu0 %vm52_vm1, %v42_v12  ;;  %v382_v25 = vld [vmem:[%s1737_s0 + $0x2] sm:$0xff]  ;;  %v383_v27 = vld [vmem:[%s1737_s0 + $0xa] sm:$0xff]  ;;  %v36_v30 = vld [vmem:[%s1737_s0 + $0x58] sm:$0x1f] }
   0xb   :  { %1231 = vmatprep.mubr.msk.f32.mxu1 %vm52_vm1, %v27_v13  ;;  %1247 = vmatpush3.msk.msra.mxu0 %vm89_vm0, %v1096_v9  ;;  %v34_v26 = vld [vmem:[%s1737_s0 + $0x48] sm:$0xff]  ;;  %v35_v28 = vld [vmem:[%s1737_s0 + $0x50] sm:$0xff]  ;;  %v389_v38 = vld [vmem:[%s1737_s0 + $0x3a] sm:$0xff] }
   0xc   :  { %v386_v32 = vld [vmem:[%s1737_s0 + $0x22] sm:$0xff]  ;;  %v387_v34 = vld [vmem:[%s1737_s0 + $0x2a] sm:$0xff]  ;;  %v388_v36 = vld [vmem:[%s1737_s0 + $0x32] sm:$0xff]  ;;  %1286 = vmatprep.subr.mxu0 %v1339_v52  ;;  %1313 = vmatprep.subr.mxu1 %v1339_v52 }
   0xd   :  { %1215 = vmatmul.mubr.msk.f32.gmra.mxu0 %vm52_vm1, %v43_v14  ;;  %1232 = vmatmul.mubr.msk.f32.gmra.mxu1 %vm52_vm1, %v28_v15  ;;  %v572_v33 = vld [vmem:[%s1737_s0 + $0x3] sm:$0xff]  ;;  %v573_v35 = vld [vmem:[%s1737_s0 + $0xb] sm:$0xff]  ;;  %v574_v37 = vld [vmem:[%s1737_s0 + $0x13] sm:$0xff] }
   0xe   :  { %1217 = vmatprep.mubr.msk.f32.mxu0 %vm52_vm1, %v44_v16  ;;  %1234 = vmatprep.mubr.msk.f32.mxu1 %vm52_vm1, %v29_v17  ;;  %v575_v39 = vld [vmem:[%s1737_s0 + $0x1b] sm:$0xff]  ;;  %v576_v41 = vld [vmem:[%s1737_s0 + $0x23] sm:$0xff]  ;;  %v577_v43 = vld [vmem:[%s1737_s0 + $0x2b] sm:$0xff] }
   0xf   :  { %v390_v40 = vld [vmem:[%s1737_s0 + $0x42] sm:$0xff]  ;;  %v391_v42 = vld [vmem:[%s1737_s0 + $0x4a] sm:$0xff]  ;;  %v392_v44 = vld [vmem:[%s1737_s0 + $0x52] sm:$0xff] }
  0x10   :  { %v578_v45 = vld [vmem:[%s1737_s0 + $0x33] sm:$0xff]  ;;  %v579_v47 = vld [vmem:[%s1737_s0 + $0x3b] sm:$0xff]  ;;  %v580_v48 = vld [vmem:[%s1737_s0 + $0x43] sm:$0xff] }
  0x11   :  { %1218 = vmatmul.mubr.msk.f32.gmra.mxu0 %vm52_vm1, %v45_v18  ;;  %1235 = vmatmul.mubr.msk.f32.gmra.mxu1 %vm52_vm1, %v30_v19  ;;  %v393_v46 = vld [vmem:[%s1737_s0 + $0x5a] sm:$0x1f]  ;;  %v581_v49 = vld [vmem:[%s1737_s0 + $0x4b] sm:$0xff]  ;;  %v793_v18 = vlaneseq }
  0x12   :  { %1220 = vmatprep.mubr.msk.f32.mxu0 %vm52_vm1, %v46_v20  ;;  %1237 = vmatprep.mubr.msk.f32.mxu1 %vm52_vm1, %v31_v21  ;;  %v582_v50 = vld [vmem:[%s1737_s0 + $0x53] sm:$0xff]  ;;  %v583_v51 = vld [vmem:[%s1737_s0 + $0x5b] sm:$0x1f]  ;;  %v905_v55 = vld [vmem:[%s1738_s4 + $0x8] sm:$0xff] }
  0x13   :  { %v907_v53 = vld [vmem:[%s1738_s4 + $0x18] sm:$0xff]  ;;  %v906_v54 = vld [vmem:[%s1738_s4 + $0x10] sm:$0xff] }
  0x15   :  { %1221 = vmatmul.mubr.msk.f32.gmra.mxu0 %vm52_vm1, %v47_v22  ;;  %1238 = vmatmul.mubr.msk.f32.gmra.mxu1 %vm52_vm1, %v32_v23  ;;  %v794_v23 = vshrl.u32 %v793_v18, 7 }
  0x16   :  { %1240 = vmatprep.mubr.msk.f32.mxu1 %vm52_vm1, %v33_v24  ;;  %1248 = vmatprep.mubr.msk.f32.mxu0 %vm52_vm1, %v382_v25 }
  0x19   :  { %1241 = vmatmul.mubr.msk.f32.gmra.mxu1 %vm52_vm1, %v34_v26  ;;  %1249 = vmatmul.mubr.msk.f32.vlgmr.msra.gmra.mxu0 %vm52_vm1, %v383_v27 }
  0x1a   :  { %1243 = vmatprep.mubr.msk.f32.mxu1 %vm52_vm1, %v35_v28  ;;  %1251 = vmatprep.mubr.msk.f32.mxu0 %vm52_vm1, %v384_v29  ;;  %v796_v28 = vand.u32 127, %v793_v18  ;;  %v797_v29 = vmul.u32 16, %v794_v23 }
  0x1d   :  { %1244 = vmatmul.mubr.msk.f32.gmra.mxu1 %vm52_vm1, %v36_v30  ;;  %1252 = vmatmul.mubr.msk.f32.gmra.mxu0 %vm52_vm1, %v385_v31 }
  0x1e   :  { %1254 = vmatprep.mubr.msk.f32.mxu0 %vm52_vm1, %v386_v32  ;;  %1268 = vmatprep.mubr.msk.f32.mxu1 %vm52_vm1, %v572_v33 }
  0x21   :  { %1255 = vmatmul.mubr.msk.f32.gmra.mxu0 %vm52_vm1, %v387_v34  ;;  %1269 = vmatmul.mubr.msk.f32.vlgmr.msra.gmra.mxu1 %vm52_vm1, %v573_v35  ;;  %v1646_v34 = vsub.s32 %v796_v28, %v797_v29 }
  0x22   :  { %1257 = vmatprep.mubr.msk.f32.mxu0 %vm52_vm1, %v388_v36  ;;  %1271 = vmatprep.mubr.msk.f32.mxu1 %vm52_vm1, %v574_v37 }
  0x23   :  { %1314 = vmatpush3.msra.mxu1 %v907_v53  ;;  %vm802_vm4 = vcmp.lt.s32.totalorder %v1646_v34, 0  ;;  %vm799_vm8 = vcmp.ge.s32.totalorder %v1646_v34, 0  ;;  %vm800_vm9 = vcmp.le.s32.totalorder %v1646_v34, 12 }
  0x24   :  { %1315 = vmatprep.subr.mxu1 %v1339_v52  ;;  %vm801_vm10 = vmand %vm799_vm8, %vm800_vm9 }
  0x25   :  { %1258 = vmatmul.mubr.msk.f32.gmra.mxu0 %vm52_vm1, %v389_v38  ;;  %1272 = vmatmul.mubr.msk.f32.gmra.mxu1 %vm52_vm1, %v575_v39  ;;  %v803_v38 = vsub.s32 0, %v1646_v34 }
  0x26   :  { %1260 = vmatprep.mubr.msk.f32.mxu0 %vm52_vm1, %v390_v40  ;;  %1274 = vmatprep.mubr.msk.f32.mxu1 %vm52_vm1, %v576_v41 }
  0x27   :  { %1316 = vmatpush3.msra.mxu1 %v906_v54 }
  0x28   :  { %1317 = vmatprep.subr.mxu1 %v1339_v52 }
  0x29   :  { %1261 = vmatmul.mubr.msk.f32.gmra.mxu0 %vm52_vm1, %v391_v42  ;;  %1275 = vmatmul.mubr.msk.f32.gmra.mxu1 %vm52_vm1, %v577_v43  ;;  %v1125_v42 = vmin.u32 %v803_v38, %v1646_v34  ;;  %v1653_v38 = vld [vmem:[%s1739_s2] ss:$0 sm:$0xff] }
  0x2a   :  { %1263 = vmatprep.mubr.msk.f32.mxu0 %vm52_vm1, %v392_v44  ;;  %1277 = vmatprep.mubr.msk.f32.mxu1 %vm52_vm1, %v578_v45 }
  0x2b   :  { %1318 = vmatpush3.msra.mxu1 %v905_v55  ;;  %v806_v54 = vand.u32 1, %v1125_v42 }
  0x2c   :  { %1319 = vmatprep.subr.mxu1 %v1339_v52 }
  0x2d   :  { %1264 = vmatmul.mubr.msk.f32.gmra.mxu0 %vm52_vm1, %v393_v46  ;;  %1278 = vmatmul.mubr.msk.f32.gmra.mxu1 %vm52_vm1, %v579_v47 }
  0x2e   :  { %1280 = vmatprep.mubr.msk.f32.mxu1 %vm52_vm1, %v580_v48  ;;  %1310 = vmatprep.mubr.msk.f32.mxu0 %vm1340_vm2, %v1339_v52 }
  0x31   :  { %1281 = vmatmul.mubr.msk.f32.gmra.mxu1 %vm52_vm1, %v581_v49 }
  0x32   :  { %1283 = vmatprep.mubr.msk.f32.mxu1 %vm52_vm1, %v582_v50 }
  0x35   :  { %1284 = vmatmul.mubr.msk.f32.gmra.mxu1 %vm52_vm1, %v583_v51 }
  0x36   :  { %1321 = vmatprep.mubr.msk.f32.mxu1 %vm1340_vm2, %v1339_v52 }
  0xc5   :  { %v1608_v56 = vpop.f32.mrf.mxu0  ;;  %v1225_v57 = vpop.f32.mrf.mxu1 }
  0xc7   :  { %v1610_v58 = vpop.f32.mrf.mxu0  ;;  %v209_v59 = vpop.f32.mrf.mxu1 }
  0xc9   :  { %v1612_v60 = vpop.f32.mrf.mxu0  ;;  %v1614_v61 = vpop.f32.mrf.mxu1 }
  0xcb   :  { %v1616_v62 = vpop.f32.mrf.mxu0  ;;  %v1618_v63 = vpop.f32.mrf.mxu1 }
  0xcd   :  { %v1620_v0 = vpop.f32.mrf.mxu0  ;;  %v1622_v1 = vpop.f32.mrf.mxu1 }
  0xcf   :  { %v1624_v2 = vpop.f32.mrf.mxu0  ;;  %v1626_v3 = vpop.f32.mrf.mxu1 }
  0xd1   :  { %v1219_v4 = vpop.f32.mrf.mxu0  ;;  %v1236_v5 = vpop.f32.mrf.mxu1 }
  0xd3   :  { %v189_v6 = vpop.f32.mrf.mxu0  ;;  %v1628_v7 = vpop.f32.mrf.mxu1 }
  0xd5   :  { %v1222_v8 = vpop.f32.mrf.mxu0  ;;  %v1239_v9 = vpop.f32.mrf.mxu1 }
  0xd6   :  { %v359_v51 = vadd.f32 %v1239_v9, %v1219_v4  ;;  %v349_v4 = vadd.f32 %v1236_v5, %v1620_v0  ;;  %v339_v0 = vadd.f32 %v1622_v1, %v1612_v60  ;;  %v329_v1 = vadd.f32 %v1614_v61, %v1608_v56 }
  0xd7   :  { %v199_v10 = vpop.f32.mrf.mxu0  ;;  %v353_v11 = vpop.f32.mrf.mxu1 }
  0xd8   :  { %v354_v29 = vadd.f32 %v353_v11, %v189_v6 }
  0xd9   :  { %v1242_v12 = vpop.f32.mrf.mxu1  ;;  %v1630_v13 = vpop.f32.mrf.mxu0 }
  0xda   :  { %v369_v43 = vadd.f32 %v1242_v12, %v1222_v8  ;;  %v561_v56 = vadd.f32 %v1630_v13, %v329_v1 }
  0xdb   :  { %v363_v14 = vpop.f32.mrf.mxu1  ;;  %v1632_v15 = vpop.f32.mrf.mxu0 }
  0xdc   :  { %v364_v47 = vadd.f32 %v363_v14, %v199_v10  ;;  %v807_v14 = vsub.s32 0, %v806_v54 }
  0xdd   :  { %v1245_v16 = vpop.f32.mrf.mxu1  ;;  %v1634_v17 = vpop.f32.mrf.mxu0 }
  0xde   :  { %v379_v44 = vadd.f32 %v1245_v16, %v1225_v57  ;;  %v808_v5 = vsel %vm802_vm4, %v807_v14, %v806_v54  ;;  %v902_v54 = vld [vmem:[%s1740_s3 + $0x10] sm:$0xff] }
  0xdf   :  { %v373_v19 = vpop.f32.mrf.mxu1  ;;  %v1636_v20 = vpop.f32.mrf.mxu0  ;;  %vm809_vm5 = vcmp.ne.s32.totalorder %v808_v5, 0  ;;  %vm810_vm6 = vcmp.lt.s32.totalorder %v808_v5, 0 }
  0xe0   :  { %v374_v48 = vadd.f32 %v373_v19, %v209_v59  ;;  %vm1686_vm7 = vmand %vm810_vm6, %vm809_vm5 }
  0xe1   :  { %v1256_v21 = vpop.f32.mrf.mxu0  ;;  %v1638_v22 = vpop.f32.mrf.mxu1 }
  0xe3   :  { %v521_v24 = vpop.f32.mrf.mxu0  ;;  %v1640_v25 = vpop.f32.mrf.mxu1 }
  0xe5   :  { %v1259_v26 = vpop.f32.mrf.mxu0  ;;  %v1642_v27 = vpop.f32.mrf.mxu1 }
  0xe6   :  { %v567_v8 = vadd.f32 %v1259_v26, %v359_v51  ;;  %v565_v26 = vadd.f32 %v1256_v21, %v349_v4 }
  0xe7   :  { %v531_v30 = vpop.f32.mrf.mxu0  ;;  %v1644_v31 = vpop.f32.mrf.mxu1 }
  0xe8   :  { %v566_v9 = vadd.f32 %v531_v30, %v354_v29 }
  0xe9   :  { %v1262_v32 = vpop.f32.mrf.mxu0  ;;  %v1276_v33 = vpop.f32.mrf.mxu1 }
  0xea   :  { %v569_v49 = vadd.f32 %v1262_v32, %v369_v43  ;;  %v344_v32 = vadd.f32 %v1628_v7, %v1624_v2  ;;  %v334_v2 = vadd.f32 %v1626_v3, %v1616_v62  ;;  %v563_v7 = vadd.f32 %v1634_v17, %v339_v0 }
  0xeb   :  { %v541_v35 = vpop.f32.mrf.mxu0  ;;  %v711_v36 = vpop.f32.mrf.mxu1  ;;  %v324_v17 = vadd.f32 %v1618_v63, %v1610_v58  ;;  %v751_v63 = vadd.f32 %v1638_v22, %v561_v56 }
  0xec   :  { %v568_v55 = vadd.f32 %v541_v35, %v364_v47  ;;  %v564_v30 = vadd.f32 %v521_v24, %v344_v32  ;;  %v562_v24 = vadd.f32 %v1636_v20, %v334_v2  ;;  %v753_v62 = vadd.f32 %v1642_v27, %v563_v7 }
  0xed   :  { %v1279_v37 = vpop.f32.mrf.mxu1  ;;  %v1265_v39 = vpop.f32.mrf.mxu0  ;;  %v560_v58 = vadd.f32 %v1632_v15, %v324_v17  ;;  %v770_v22 = vadd.f32 %v1653_v38, %v751_v63 }
  0xee   :  { %v571_v50 = vadd.f32 %v1265_v39, %v379_v44  ;;  %v757_v16 = vadd.f32 %v1279_v37, %v567_v8  ;;  %v755_v37 = vadd.f32 %v1276_v33, %v565_v26  ;;  %v754_v21 = vadd.f32 %v711_v36, %v564_v30 }
  0xef   :  { %v721_v40 = vpop.f32.mrf.mxu1  ;;  %v551_v45 = vpop.f32.mrf.mxu0  ;;  %v812_v36 = vadd.s32 2, %v808_v5  ;;  %v752_v61 = vadd.f32 %v1644_v31, %v562_v24  ;;  %v772_v27 = vadd.f32 %v1653_v38, %v753_v62 }
  0xf0   :  { %v570_v18 = vadd.f32 %v551_v45, %v374_v48  ;;  %v756_v35 = vadd.f32 %v721_v40, %v566_v9  ;;  %v776_v42 = vadd.f32 %v1653_v38, %v757_v16  ;;  %v774_v3 = vadd.f32 %v1653_v38, %v755_v37 }
  0xf1   :  { %v1282_v41 = vpop.f32.mrf.mxu1  ;;  %v773_v44 = vadd.f32 %v1653_v38, %v754_v21  ;;  %v813_v31 = vsel %vm1686_vm7, %v812_v36, %v808_v5  ;;  %v771_v47 = vadd.f32 %v1653_v38, %v752_v61  ;;  %v784_v48 = vmax.f32 %v772_v27, 0.0 }
  0xf2   :  { %v759_v23 = vadd.f32 %v1282_v41, %v569_v49  ;;  %v775_v40 = vadd.f32 %v1653_v38, %v756_v35  ;;  %v788_v33 = vmax.f32 %v776_v42, 0.0  ;;  %v786_v13 = vmax.f32 %v774_v3, 0.0 }
  0xf3   :  { %v731_v46 = vpop.f32.mrf.mxu1  ;;  %v785_v15 = vmax.f32 %v773_v44, 0.0  ;;  %vm814_vm11 = vcmp.eq.s32.totalorder %v813_v31, 0  ;;  %v783_v49 = vmax.f32 %v771_v47, 0.0 }
  0xf4   :  { %v758_v10 = vadd.f32 %v731_v46, %v568_v55  ;;  %v778_v6 = vadd.f32 %v1653_v38, %v759_v23  ;;  %v787_v45 = vmax.f32 %v775_v40, 0.0  ;;  %v750_v46 = vadd.f32 %v1640_v25, %v560_v58  ;;  %vm815_vm12 = vmand %vm801_vm10, %vm814_vm11  ;;  %v901_v55 = vld [vmem:[%s1740_s3 + $0x8] sm:$0xff]  ;;  %v904_v23 = vld [vmem:[%s1738_s4] sm:$0xff] }
  0xf5   :  { %v1285_v53 = vpop.f32.mrf.mxu1  ;;  %v782_v25 = vmax.f32 %v770_v22, 0.0  ;;  %v816_v51 = vsel %vm815_vm12, 0.14285715, %v1339_v52  ;;  %1320 = vmatpush3.msra.mxu1 %v904_v23 }
  0xf6   :  { %v761_v28 = vadd.f32 %v1285_v53, %v571_v50  ;;  %v777_v39 = vadd.f32 %v1653_v38, %v758_v10  ;;  %v790_v43 = vmax.f32 %v778_v6, 0.0  ;;  %v769_v34 = vadd.f32 %v1653_v38, %v750_v46  ;;  %v903_v53 = vld [vmem:[%s1740_s3 + $0x18] sm:$0xff] }
  0xf7   :  { %v741_v57 = vpop.f32.mrf.mxu1 }
  0xf8   :  { %v780_v59 = vadd.f32 %v1653_v38, %v761_v28  ;;  %v760_v12 = vadd.f32 %v741_v57, %v570_v18  ;;  %v789_v60 = vmax.f32 %v777_v39, 0.0  ;;  %v781_v50 = vmax.f32 %v769_v34, 0.0  ;;  %v900_v18 = vld [vmem:[%s1740_s3] sm:$0xff] }
  0xfa   :  { %v792_v11 = vmax.f32 %v780_v59, 0.0  ;;  %v779_v19 = vadd.f32 %v1653_v38, %v760_v12 }
  0xfc   :  { %v791_v41 = vmax.f32 %v779_v19, 0.0  ;;  %1287 = vmatpush3.msk.msra.mxu0 %vm821_vm3, %v792_v11 }
  0xfd   :  { %1288 = vmatprep.subr.mxu0 %v1339_v52 }
  0xfe   :  { %1289 = vmatpush3.msra.mxu0 %v791_v41 }
  0xff   :  { %1290 = vmatprep.subr.mxu0 %v1339_v52 }
 0x100   :  { %1291 = vmatpush3.msra.mxu0 %v790_v43 }
 0x101   :  { %1292 = vmatprep.subr.mxu0 %v1339_v52 }
 0x102   :  { %1293 = vmatpush3.msra.mxu0 %v789_v60 }
 0x103   :  { %1294 = vmatprep.subr.mxu0 %v1339_v52 }
 0x104   :  { %1295 = vmatpush3.msra.mxu0 %v788_v33 }
 0x105   :  { %1296 = vmatprep.subr.mxu0 %v1339_v52 }
 0x106   :  { %1297 = vmatpush3.msra.mxu0 %v787_v45 }
 0x107   :  { %1298 = vmatprep.subr.mxu0 %v1339_v52 }
 0x108   :  { %1299 = vmatpush3.msra.mxu0 %v786_v13 }
 0x109   :  { %1300 = vmatprep.subr.mxu0 %v1339_v52 }
 0x10a   :  { %1301 = vmatpush3.msra.mxu0 %v785_v15 }
 0x10b   :  { %1302 = vmatprep.subr.mxu0 %v1339_v52 }
 0x10c   :  { %1303 = vmatpush3.msra.mxu0 %v784_v48 }
 0x10d   :  { %1304 = vmatprep.subr.mxu0 %v1339_v52 }
 0x10e   :  { %1305 = vmatpush3.msra.mxu0 %v783_v49 }
 0x10f   :  { %1306 = vmatprep.subr.mxu0 %v1339_v52 }
 0x110   :  { %1307 = vmatpush3.msra.mxu0 %v782_v25 }
 0x111   :  { %1308 = vmatprep.subr.mxu0 %v1339_v52 }
 0x112   :  { %1309 = vmatpush3.msra.mxu0 %v781_v50 }
 0x113   :  { %1311 = vmatmul.mubr.msk.f32.vlgmr.msra.gmra.mxu0 %vm817_vm13, %v816_v51  ;;  %1324 = vmatprep.subr.mxu0 %v1339_v52 }
 0x114   :  { %1332 = vmatprep.mubr.msk.f32.mxu0 %vm1340_vm2, %v1339_v52  ;;  %1325 = vmatpush3.msra.mxu0 %v903_v53 }
 0x115   :  { %1326 = vmatprep.subr.mxu0 %v1339_v52 }
 0x116   :  { %1327 = vmatpush3.msra.mxu0 %v902_v54 }
 0x117   :  { %1328 = vmatprep.subr.mxu0 %v1339_v52 }
 0x118   :  { %1329 = vmatpush3.msra.mxu0 %v901_v55 }
 0x119   :  { %1330 = vmatprep.subr.mxu0 %v1339_v52  ;;  %v11_v52 = vstv %s1741_s5 }
 0x11a   :  { %1331 = vmatpush3.msra.mxu0 %v900_v18  ;;  %12 = vst [vmem:[#allocation2] sm:$0x1] %v11_v52 }
 0x121   :  { %v1130_v4 = vld [vmem:[#allocation2] ss:$0 sm:$0xff] }
 0x1d3   :  { %v891_v28 = vpop.f32.mrf.mxu0 }
 0x1d4   :  { %v896_v29 = vrot.slane %v891_v28, 2 }
 0x1d5   :  { %v1312_v38 = vpop.f32.mrf.mxu0 }
 0x1d6   :  { %v898_v57 = vsub.f32 %v891_v28, %v896_v29 }
 0x1d8   :  { %v899_v8 = vand.u32 2147483647, %v898_v57 }
 0x1da   :  { %v909_v10 = vrot.slane %v899_v8, 2  ;;  %1333 = vmatmul.mubr.msk.f32.vlgmr.msra.gmra.mxu0 %vm910_vm14, %v899_v8 }
 0x1dc   :  { %1322 = vmatmul.mubr.msk.f32.vlgmr.msra.gmra.mxu1 %vm910_vm14, %v909_v10 }
 0x29a   :  { %v1051_v59 = vpop.f32.mrf.mxu0 }
 0x29c   :  { %v979_v12 = vpop.f32.mrf.mxu1  ;;  %v1334_v9 = vpop.f32.mrf.mxu0 }
 0x29d   :  { %v1052_v14 = vadd.f32 %v1051_v59, %v979_v12 }
 0x29e   :  { %v1323_v16 = vpop.f32.mrf.mxu1 }
 0x29f   :  { %v1062_v6 = vadd.f32 %v1130_v4, %v1052_v14 }
 0x2a1   :  { %1064 = vst.msk [vmem:[%s1742_s6] sm:$0x3] %vm1063_vm15, %v1062_v6 }

</bundles_post_ra>
